<compile_context>
chip_gen: v5e
topology: v5e:2x2
jax: 0.10.0
libtpu: 0.0.40
codegen_flags: <defaults>
</compile_context>

<pallas_src>
import jax
import jax.numpy as jnp
from jax.experimental import pallas as pl
from jax.experimental.pallas import tpu as pltpu

LANE = 128
SUBLANE = 8
_TM_CANDIDATES = (8192, 4096, 2048, 1024, 512, 256, 128, 64, 32, 16, 8)


def _round_up(x, m):
    return ((x + m - 1) // m) * m


def _vmem_budget():
    """(tile_budget_bytes, vmem_limit_bytes), sized per TPU generation."""
    cap = 0
    try:
        cap = int(pltpu.get_tpu_info().vmem_capacity_bytes)
    except Exception:
        cap = 0
    if cap <= 0:
        cap = 64 * 1024 * 1024          # conservative fallback (v7x per-core VMEM)
    return int(cap * 0.65), int(cap * 0.85)


def _pick_tiles(M, kp, n_pad, in_bytes, out_bytes, budget):
    """Pick (tm, tk, single_k): biggest row tile that fits the VMEM budget once
    double-buffered, preferring the single-K-step path (weight VMEM-resident,
    no accumulator scratch)."""
    m_full = max(SUBLANE, _round_up(M, SUBLANE))
    cands = [c for c in _TM_CANDIDATES if c <= m_full] or [m_full]
    # Guarantee >=2 row tiles when M is big enough so both v7x TensorCores get
    # work on the "parallel" axis.
    if M >= 256:
        split = [c for c in cands if c < M]
        if split:
            cands = split

    def fits_single(tm):
        return (2 * tm * kp * in_bytes            # patch tile, double buffered
                + 2 * kp * n_pad * in_bytes       # resident weight (2x to be safe)
                + 2 * tm * n_pad * out_bytes      # output tile, double buffered
                ) <= budget

    def fits_tiled(tm, tk):
        return (2 * tm * tk * in_bytes
                + 2 * tk * n_pad * in_bytes
                + 2 * tm * n_pad * out_bytes
                + tm * n_pad * 4                  # resident f32 accumulator
                ) <= budget

    for tm in cands:                              # path 1: single K step
        if fits_single(tm):
            return tm, kp, True
    for tm in cands:                              # path 2: stream K (tm first, then tk)
        for tk in (512, 256, 128):
            if kp % tk == 0 and fits_tiled(tm, tk):
                return tm, tk, False
    return cands[-1], 128, False                  # last resort


def _gemm_relu_single_k_kernel(p_ref, w_ref, o_ref):
    """Whole contraction in one MXU matmul; f32 accumulate, fused ReLU."""
    acc = jnp.dot(p_ref[...], w_ref[...], preferred_element_type=jnp.float32)
    o_ref[...] = jnp.maximum(acc, 0.0).astype(o_ref.dtype)


def _gemm_relu_acc_kernel(p_ref, w_ref, o_ref, acc_ref):
    """K-tiled matmul with resident f32 accumulator, ReLU on the last K step."""
    k = pl.program_id(1)

    @pl.when(k == 0)
    def _init():
        acc_ref[...] = jnp.zeros_like(acc_ref)

    acc_ref[...] += jnp.dot(p_ref[...], w_ref[...],
                            preferred_element_type=jnp.float32)

    @pl.when(k == pl.num_programs(1) - 1)
    def _finalize():
        o_ref[...] = jnp.maximum(acc_ref[...], 0.0).astype(o_ref.dtype)


def gen_block_down_relu(x, w, *, in_layout="NCHW", out_layout="NCHW",
                        compute_dtype=jnp.bfloat16, out_dtype=None):
    """GenBlock(down=True, activation='relu', use_dropout=False) forward.

    x: (N, C_in, H, W) if in_layout == "NCHW" (PyTorch), else (N, H, W, C_in).
    w: (C_out, C_in, 4, 4) float32 (OIHW, PyTorch layout).
    For chained blocks pass in_layout=out_layout="NHWC" to skip the boundary
    transposes; out_dtype defaults to compute_dtype (bf16).
    """
    if out_dtype is None:
        out_dtype = compute_dtype

    KH = KW = 4
    S = 2
    P = 1

    x_nhwc = jnp.transpose(x, (0, 2, 3, 1)) if in_layout == "NCHW" else x
    N, H, W, C = x_nhwc.shape
    C_out = w.shape[0]

    # bf16 BEFORE pad/slice/concat: the whole im2col pre-pass runs at half width.
    x_nhwc = x_nhwc.astype(compute_dtype)
    # jnp.pad 'reflect' matches PyTorch padding_mode='reflect'.
    xp = jnp.pad(x_nhwc, ((0, 0), (P, P), (P, P), (0, 0)), mode="reflect")
    Hp, Wp = H + 2 * P, W + 2 * P
    OH = (Hp - KH) // S + 1
    OW = (Wp - KW) // S + 1

    M = N * OH * OW
    K = C * KH * KW
    kp = _round_up(K, LANE)                      # lane-aligned contraction
    n_pad = _round_up(C_out, LANE)               # lane-dense output slab

    # im2col in NHWC, K order = (kh, kw, c); the K zero-pad is appended inside
    # the same concatenate (no extra full-array pad pass, exact since ReLU(0)=0
    # rows are sliced off and zero K columns meet zero weight rows).
    cols = [xp[:, i:i + S * OH:S, j:j + S * OW:S, :]     # each (N, OH, OW, C)
            for i in range(KH) for j in range(KW)]
    if kp > K:
        cols.append(jnp.zeros((N, OH, OW, kp - K), compute_dtype))
    p = jnp.concatenate(cols, axis=-1).reshape(M, kp)

    # weight: OIHW -> (KH, KW, C_in, C_out) -> (K, C_out), same (kh, kw, c) order
    w_mat = jnp.transpose(w, (2, 3, 1, 0)).reshape(K, C_out).astype(compute_dtype)
    w_mat = jnp.pad(w_mat, ((0, kp - K), (0, n_pad - C_out)))

    in_bytes = jnp.dtype(compute_dtype).itemsize
    out_bytes = jnp.dtype(out_dtype).itemsize
    budget, vmem_limit = _vmem_budget()
    tm, tk, single_k = _pick_tiles(M, kp, n_pad, in_bytes, out_bytes, budget)

    mp = _round_up(M, tm)
    if mp > M:                                   # usually a no-op (power-of-two M)
        p = jnp.pad(p, ((0, mp - M), (0, 0)))

    cost = pl.CostEstimate(                       # true (unpadded) dimensions
        flops=2 * M * K * C_out,
        transcendentals=0,
        bytes_accessed=(M * K * in_bytes + K * C_out * in_bytes
                        + M * C_out * out_bytes),
    )

    if single_k:
        kernel = _gemm_relu_single_k_kernel
        grid = (mp // tm,)
        in_specs = [pl.BlockSpec((tm, kp), lambda i: (i, 0)),        # patch tile
                    pl.BlockSpec((kp, n_pad), lambda i: (0, 0))]     # weight: DMA'd once
        out_specs = pl.BlockSpec((tm, n_pad), lambda i: (i, 0))
        scratch = ()
        dims = ("parallel",)
    else:
        kernel = _gemm_relu_acc_kernel
        grid = (mp // tm, kp // tk)               # reduction axis last
        in_specs = [pl.BlockSpec((tm, tk), lambda i, k: (i, k)),
                    pl.BlockSpec((tk, n_pad), lambda i, k: (k, 0))]
        out_specs = pl.BlockSpec((tm, n_pad), lambda i, k: (i, 0))
        scratch = (pltpu.VMEM((tm, n_pad), jnp.float32),)
        dims = ("parallel", "arbitrary")

    out = pl.pallas_call(
        kernel,
        out_shape=jax.ShapeDtypeStruct((mp, n_pad), out_dtype),
        grid_spec=pltpu.PrefetchScalarGridSpec(
            num_scalar_prefetch=0,
            grid=grid,
            in_specs=in_specs,
            out_specs=out_specs,
            scratch_shapes=scratch,
        ),
        compiler_params=pltpu.CompilerParams(
            dimension_semantics=dims,
            vmem_limit_bytes=vmem_limit,
        ),
        cost_estimate=cost,
    )(p, w_mat)

    out = out[:M, :C_out].reshape(N, OH, OW, C_out)    # NHWC slab from kernel
    if out_layout == "NHWC":
        return out
    # Single fused XLA transpose only when PyTorch NCHW parity is required.
    return jnp.transpose(out, (0, 3, 1, 2))


def _reference(x, w):
    # f32 reference with XLA conv (reflect pad + VALID conv, stride 2) + ReLU.
    P = 1
    xp = jnp.pad(x, ((0, 0), (0, 0), (P, P), (P, P)), mode="reflect")
    y = jax.lax.conv_general_dilated(
        xp, w, window_strides=(2, 2), padding="VALID",
        dimension_numbers=("NCHW", "OIHW", "NCHW"),
    )
    return jnp.maximum(y, 0.0)


if __name__ == "__main__":
    key = jax.random.PRNGKey(0)
    kx, kw = jax.random.split(key)

    N, C_in, C_out, H, W = 2, 4, 8, 16, 16
    x = jax.random.normal(kx, (N, C_in, H, W), dtype=jnp.float32)
    # deterministic Conv2d weight init (Kaiming-uniform-like scale, no bias)
    fan_in = C_in * 4 * 4
    bound = (1.0 / fan_in) ** 0.5
    w = jax.random.uniform(kw, (C_out, C_in, 4, 4), dtype=jnp.float32,
                           minval=-bound, maxval=bound)

    # NCHW-in / NCHW-out (PyTorch parity) path.
    y = jax.jit(gen_block_down_relu)(x, w)
    y = jax.block_until_ready(y)

    y_ref = _reference(x, w)
    assert y.shape == (N, C_out, H // 2, W // 2), y.shape
    # bf16 matmul operands + bf16 output vs f32 reference -> looser tolerances.
    assert jnp.allclose(y.astype(jnp.float32), y_ref, atol=2e-2, rtol=2e-2), \
        "NCHW path mismatch vs reference"

    # NHWC-in / NHWC-out fast path (what a chained generator should use).
    y_nhwc = gen_block_down_relu(jnp.transpose(x, (0, 2, 3, 1)), w,
                                 in_layout="NHWC", out_layout="NHWC")
    y_nhwc = jax.block_until_ready(y_nhwc)
    assert jnp.allclose(jnp.transpose(y_nhwc, (0, 3, 1, 2)).astype(jnp.float32),
                        y_ref, atol=2e-2, rtol=2e-2), "NHWC path mismatch"

    print("KERNEL_OK")
</pallas_src>

<mosaic_0001>
module attributes {stable_mosaic.version = 11 : i64} {
  func.func @_gemm_relu_single_k_kernel(%arg0: i32, %arg1: memref<128x128xbf16, #tpu.memory_space<vmem>>, %arg2: memref<128x128xbf16, #tpu.memory_space<vmem>>, %arg3: memref<128x128xbf16, #tpu.memory_space<vmem>>) attributes {dimension_semantics = [#tpu.dimension_semantics<parallel>], iteration_bounds = array<i64: 1>, scalar_prefetch = 0 : i64, scratch_operands = 0 : i64, tpu.core_type = #tpu.core_type<tc>, window_params = [{transform_indices = @transform_0, window_bounds = array<i64: 128, 128>}, {pipeline_mode = #tpu.pipeline_mode<synchronous>, transform_indices = @transform_1, window_bounds = array<i64: 128, 128>}, {transform_indices = @transform_2, window_bounds = array<i64: 128, 128>}]} {
    %c0 = arith.constant 0 : index
    %c0_0 = arith.constant 0 : index
    %0 = vector.load %arg1[%c0, %c0_0] : memref<128x128xbf16, #tpu.memory_space<vmem>>, vector<128x128xbf16>
    %c0_1 = arith.constant 0 : index
    %c0_2 = arith.constant 0 : index
    %1 = vector.load %arg2[%c0_1, %c0_2] : memref<128x128xbf16, #tpu.memory_space<vmem>>, vector<128x128xbf16>
    %cst = arith.constant dense<0.000000e+00> : vector<128x128xf32>
    %2 = tpu.matmul %0, %1, %cst {dimension_numbers = #tpu.dot_dimension_numbers<[1], [0], [0], [1], [0, 0, 1, 1], [], []>} : vector<128x128xbf16>, vector<128x128xbf16>, vector<128x128xf32> -> vector<128x128xf32>
    %cst_3 = arith.constant 0.000000e+00 : f32
    %3 = vector.broadcast %cst_3 : f32 to vector<128x128xf32>
    %4 = arith.maximumf %2, %3 : vector<128x128xf32>
    %5 = arith.truncf %4 : vector<128x128xf32> to vector<128x128xbf16>
    %c0_4 = arith.constant 0 : index
    %c0_5 = arith.constant 0 : index
    %6 = vector.load %arg3[%c0_4, %c0_5] : memref<128x128xbf16, #tpu.memory_space<vmem>>, vector<128x128xbf16>
    tpu.vector_store %arg3[%c0_4, %c0_5], %5 {strides = array<i32>} : memref<128x128xbf16, #tpu.memory_space<vmem>>, vector<128x128xbf16>,
    return
  }
  func.func @transform_0(%arg0: i32) -> (i32, i32) {
    %c0_i32 = arith.constant 0 : i32
    %c0_i32_0 = arith.constant 0 : i32
    return %arg0, %c0_i32 : i32, i32
  }
  func.func @transform_1(%arg0: i32) -> (i32, i32) {
    %c0_i32 = arith.constant 0 : i32
    %c0_i32_0 = arith.constant 0 : i32
    %c0_i32_1 = arith.constant 0 : i32
    return %c0_i32, %c0_i32_0 : i32, i32
  }
  func.func @transform_2(%arg0: i32) -> (i32, i32) {
    %c0_i32 = arith.constant 0 : i32
    %c0_i32_0 = arith.constant 0 : i32
    return %arg0, %c0_i32 : i32, i32
  }
}

</mosaic_0001>

<bundles_post_ra>
// kernel: gen_block_down_relu.1
= control target key start
LH: loop header
LB: loop body
LE: loop exit
PB: predicated region body
PF: predicated region fallthrough
CT: control target
= control target key end

     0   :  { %s478_s1 = inlined_call_operand.vmem [shape: bf16[128,128], index: 1, kind: input, shape index: {}]   ;;  %s479_s0 = inlined_call_operand.vmem [shape: bf16[128,128], index: 0, kind: input, shape index: {}]   ;;  %s480_s2 = inlined_call_operand.vmem [shape: bf16[128,128], index: 2, kind: output, shape index: {}]  }
   0x1   :  { %v319_v0 = vld [vmem:[%s478_s1 + $0x38] sm:$0xff]  ;;  %v318_v1 = vld [vmem:[%s478_s1 + $0x30] sm:$0xff]  ;;  %v317_v2 = vld [vmem:[%s478_s1 + $0x28] sm:$0xff] }
   0x2   :  { %139 = vmatpush.bf16.msra.mxu0 %v319_v0  ;;  %367 = vmatpush.bf16.msra.mxu1 %v319_v0  ;;  %v316_v3 = vld [vmem:[%s478_s1 + $0x20] sm:$0xff]  ;;  %v315_v4 = vld [vmem:[%s478_s1 + $0x18] sm:$0xff]  ;;  %v314_v5 = vld [vmem:[%s478_s1 + $0x10] sm:$0xff] }
   0x3   :  { %368 = vmatpush.bf16.msra.mxu2 %v319_v0  ;;  %369 = vmatpush.bf16.msra.mxu3 %v319_v0  ;;  %v313_v6 = vld [vmem:[%s478_s1 + $0x8] sm:$0xff]  ;;  %v312_v7 = vld [vmem:[%s478_s1] sm:$0xff]  ;;  %v306_v9 = vld [vmem:[%s479_s0 + $0x10] sm:$0xff] }
   0x4   :  { %v304_v8 = vld [vmem:[%s479_s0] sm:$0xff]  ;;  %v310_v11 = vld [vmem:[%s479_s0 + $0x30] sm:$0xff]  ;;  %v305_v12 = vld [vmem:[%s479_s0 + $0x8] sm:$0xff] }
   0x5   :  { %v308_v10 = vld [vmem:[%s479_s0 + $0x20] sm:$0xff]  ;;  %v307_v13 = vld [vmem:[%s479_s0 + $0x18] sm:$0xff]  ;;  %v309_v14 = vld [vmem:[%s479_s0 + $0x28] sm:$0xff] }
   0x6   :  { %140 = vmatpush.bf16.msra.mxu0 %v318_v1  ;;  %370 = vmatpush.bf16.msra.mxu1 %v318_v1  ;;  %v311_v15 = vld [vmem:[%s479_s0 + $0x38] sm:$0xff] }
   0x7   :  { %371 = vmatpush.bf16.msra.mxu2 %v318_v1  ;;  %372 = vmatpush.bf16.msra.mxu3 %v318_v1 }
   0xa   :  { %141 = vmatpush.bf16.msra.mxu0 %v317_v2  ;;  %373 = vmatpush.bf16.msra.mxu1 %v317_v2 }
   0xb   :  { %374 = vmatpush.bf16.msra.mxu2 %v317_v2  ;;  %375 = vmatpush.bf16.msra.mxu3 %v317_v2 }
   0xe   :  { %142 = vmatpush.bf16.msra.mxu0 %v316_v3  ;;  %376 = vmatpush.bf16.msra.mxu1 %v316_v3 }
   0xf   :  { %377 = vmatpush.bf16.msra.mxu2 %v316_v3  ;;  %378 = vmatpush.bf16.msra.mxu3 %v316_v3 }
  0x12   :  { %143 = vmatpush.bf16.msra.mxu0 %v315_v4  ;;  %379 = vmatpush.bf16.msra.mxu1 %v315_v4 }
  0x13   :  { %380 = vmatpush.bf16.msra.mxu2 %v315_v4  ;;  %381 = vmatpush.bf16.msra.mxu3 %v315_v4 }
  0x16   :  { %144 = vmatpush.bf16.msra.mxu0 %v314_v5  ;;  %382 = vmatpush.bf16.msra.mxu1 %v314_v5 }
  0x17   :  { %383 = vmatpush.bf16.msra.mxu2 %v314_v5  ;;  %384 = vmatpush.bf16.msra.mxu3 %v314_v5 }
  0x1a   :  { %145 = vmatpush.bf16.msra.mxu0 %v313_v6  ;;  %385 = vmatpush.bf16.msra.mxu1 %v313_v6 }
  0x1b   :  { %386 = vmatpush.bf16.msra.mxu2 %v313_v6  ;;  %387 = vmatpush.bf16.msra.mxu3 %v313_v6 }
  0x1e   :  { %146 = vmatpush.bf16.msra.mxu0 %v312_v7  ;;  %388 = vmatpush.bf16.msra.mxu1 %v312_v7 }
  0x1f   :  { %389 = vmatpush.bf16.msra.mxu2 %v312_v7  ;;  %390 = vmatpush.bf16.msra.mxu3 %v312_v7 }
  0x21   :  { %147 = vmatmul.bf16.vlgmr.msra.gmra.mxu0 %v304_v8  ;;  %157 = vmatmul.bf16.vlgmr.msra.gmra.mxu1 %v306_v9 }
  0x22   :  { %167 = vmatmul.bf16.vlgmr.msra.gmra.mxu2 %v308_v10  ;;  %177 = vmatmul.bf16.vlgmr.msra.gmra.mxu3 %v310_v11 }
  0x31   :  { %152 = vmatmul.bf16.gmra.mxu0 %v305_v12  ;;  %162 = vmatmul.bf16.gmra.mxu1 %v307_v13 }
  0x32   :  { %172 = vmatmul.bf16.gmra.mxu2 %v309_v14  ;;  %182 = vmatmul.bf16.gmra.mxu3 %v311_v15 }
  0x9e   :  { %v148_v16 = vpop.f32.mrf.mxu0  ;;  %v158_v17 = vpop.f32.mrf.mxu1 }
  0x9f   :  { %v188_v22 = vmax.f32 %v148_v16, 0.0  ;;  %v192_v23 = vmax.f32 %v158_v17, 0.0 }
  0xa5   :  { %v168_v18 = vpop.f32.mrf.mxu2  ;;  %v178_v19 = vpop.f32.mrf.mxu3 }
  0xa6   :  { %v150_v20 = vpop.f32.mrf.mxu0  ;;  %v160_v21 = vpop.f32.mrf.mxu1  ;;  %v196_v30 = vmax.f32 %v168_v18, 0.0  ;;  %v200_v31 = vmax.f32 %v178_v19, 0.0 }
  0xa7   :  { %v189_v24 = vmax.f32 %v150_v20, 0.0  ;;  %v193_v25 = vmax.f32 %v160_v21, 0.0 }
  0xa9   :  { %v323_v26 = vpack.c.bf16 %v189_v24, %v188_v22  ;;  %v333_v27 = vpack.c.bf16 %v193_v25, %v192_v23 }
  0xab   :  { %324 = vst [vmem:[%s480_s2] sm:$0xff] %v323_v26  }
  0xac   :  { %361 = vst [vmem:[%s480_s2 + $0x10] sm:$0xff] %v333_v27  }
  0xad   :  { %v170_v28 = vpop.f32.mrf.mxu2  ;;  %v180_v29 = vpop.f32.mrf.mxu3 }
  0xae   :  { %v197_v32 = vmax.f32 %v170_v28, 0.0  ;;  %v201_v33 = vmax.f32 %v180_v29, 0.0  ;;  %v153_v34 = vpop.f32.mrf.mxu0  ;;  %v163_v35 = vpop.f32.mrf.mxu1 }
  0xaf   :  { %v190_v42 = vmax.f32 %v153_v34, 0.0  ;;  %v194_v43 = vmax.f32 %v163_v35, 0.0 }
  0xb0   :  { %v343_v36 = vpack.c.bf16 %v197_v32, %v196_v30  ;;  %v353_v37 = vpack.c.bf16 %v201_v33, %v200_v31 }
  0xb2   :  { %363 = vst [vmem:[%s480_s2 + $0x20] sm:$0xff] %v343_v36  }
  0xb3   :  { %365 = vst [vmem:[%s480_s2 + $0x30] sm:$0xff] %v353_v37  }
  0xb5   :  { %v173_v38 = vpop.f32.mrf.mxu2  ;;  %v183_v39 = vpop.f32.mrf.mxu3 }
  0xb6   :  { %v155_v40 = vpop.f32.mrf.mxu0  ;;  %v165_v41 = vpop.f32.mrf.mxu1  ;;  %v198_v50 = vmax.f32 %v173_v38, 0.0  ;;  %v202_v51 = vmax.f32 %v183_v39, 0.0 }
  0xb7   :  { %v191_v44 = vmax.f32 %v155_v40, 0.0  ;;  %v195_v45 = vmax.f32 %v165_v41, 0.0 }
  0xb9   :  { %v328_v46 = vpack.c.bf16 %v191_v44, %v190_v42  ;;  %v338_v47 = vpack.c.bf16 %v195_v45, %v194_v43 }
  0xbb   :  { %360 = vst [vmem:[%s480_s2 + $0x8] sm:$0xff] %v328_v46  }
  0xbc   :  { %362 = vst [vmem:[%s480_s2 + $0x18] sm:$0xff] %v338_v47  }
  0xbd   :  { %v175_v48 = vpop.f32.mrf.mxu2  ;;  %v185_v49 = vpop.f32.mrf.mxu3 }
  0xbe   :  { %v199_v52 = vmax.f32 %v175_v48, 0.0  ;;  %v203_v53 = vmax.f32 %v185_v49, 0.0 }
  0xc0   :  { %v348_v54 = vpack.c.bf16 %v199_v52, %v198_v50  ;;  %v358_v55 = vpack.c.bf16 %v203_v53, %v202_v51 }
  0xc2   :  { %364 = vst [vmem:[%s480_s2 + $0x28] sm:$0xff] %v348_v54  }
  0xc3   :  { %366 = vst [vmem:[%s480_s2 + $0x38] sm:$0xff] %v358_v55  }

</bundles_post_ra>
